<compile_context>
chip_gen: v7x
topology: tpu7x:2x2x1
jax: 0.10.0
libtpu: 0.0.40
codegen_flags: <defaults>
</compile_context>

<pallas_src>
import functools
import math

import jax
import jax.numpy as jnp
from jax.experimental import pallas as pl
from jax.experimental.pallas import tpu as pltpu


def mha_kernel(q_ref, k_ref, v_ref,
               wq_ref, bq_ref, wk_ref, bk_ref, wv_ref, bv_ref,
               wc_ref, bc_ref, o_ref, *, n_head, d_head, tb, seq_len):
    # Row-chunk refs are (M, D) with M = tb * seq_len fused batch rows.
    m_rows = tb * seq_len

    xq = q_ref[...].astype(jnp.bfloat16)      # (M, D)
    xk = k_ref[...].astype(jnp.bfloat16)
    xv = v_ref[...].astype(jnp.bfloat16)

    # Linear projections y = x @ W^T + b.  Weights pre-transposed / bf16 on the
    # host; 1/sqrt(d_head) already folded into wq/bq so no per-score scaling.
    qp = (jnp.dot(xq, wq_ref[...], preferred_element_type=jnp.float32)
          + bq_ref[...]).astype(jnp.bfloat16)
    kp = (jnp.dot(xk, wk_ref[...], preferred_element_type=jnp.float32)
          + bk_ref[...]).astype(jnp.bfloat16)
    vp = (jnp.dot(xv, wv_ref[...], preferred_element_type=jnp.float32)
          + bv_ref[...]).astype(jnp.bfloat16)

    # Output accumulator for the w_concat projection, built per head.
    o_acc = jnp.zeros((m_rows, wc_ref.shape[1]), jnp.float32)

    for h in range(n_head):
        lo = h * d_head
        hi = lo + d_head

        # Per-head slices; reshape (M, dh) -> (tb, L, dh) splits only the major
        # (row) dimension, which is free.
        qh = qp[:, lo:hi].reshape(tb, seq_len, d_head)
        kh = kp[:, lo:hi].reshape(tb, seq_len, d_head)
        vh = vp[:, lo:hi].reshape(tb, seq_len, d_head)

        # Scores for all tb batch elements of this head: contract last dims,
        # batch over tb (single leading batch dim -> supported MXU pattern).
        s = jnp.einsum('bqd,bkd->bqk', qh, kh,
                       preferred_element_type=jnp.float32)     # (tb, L, L) f32

        # Numerically-stable softmax numerator in f32; normalize after PV.
        s = s - jnp.max(s, axis=-1, keepdims=True)
        p = jnp.exp(s)
        denom = jnp.sum(p, axis=-1, keepdims=True)              # (tb, L, 1)

        ctx = jnp.einsum('bqk,bkd->bqd', p.astype(jnp.bfloat16), vh,
                         preferred_element_type=jnp.float32)    # (tb, L, dh) f32
        ctx = ctx * pl.reciprocal(denom, approx=True)           # EUP reciprocal

        # Fold this head straight into the output projection: sublane-aligned
        # row slice of Wc^T replaces the old masked column writes to a scratch.
        o_acc = o_acc + jnp.dot(ctx.reshape(m_rows, d_head).astype(jnp.bfloat16),
                                wc_ref[lo:hi, :],
                                preferred_element_type=jnp.float32)

    o_ref[...] = (o_acc + bc_ref[...]).astype(o_ref.dtype)


def prepare_params(params, n_head):
    """One-time host-side weight prep (hoisted out of the per-call wrapper):
    transpose for x @ W^T, fold 1/sqrt(d_head) into the Q projection, cast
    weights to bf16 for the MXU; biases stay f32 (added after f32 accumulation)."""
    d_model = params["w_q"][0].shape[0]
    d_head = d_model // n_head
    inv_scale = 1.0 / math.sqrt(d_head)
    return {
        "wq": (params["w_q"][0].T * inv_scale).astype(jnp.bfloat16),
        "bq": (params["w_q"][1] * inv_scale).reshape(1, d_model).astype(jnp.float32),
        "wk": params["w_k"][0].T.astype(jnp.bfloat16),
        "bk": params["w_k"][1].reshape(1, d_model).astype(jnp.float32),
        "wv": params["w_v"][0].T.astype(jnp.bfloat16),
        "bv": params["w_v"][1].reshape(1, d_model).astype(jnp.float32),
        "wc": params["w_concat"][0].T.astype(jnp.bfloat16),
        "bc": params["w_concat"][1].reshape(1, d_model).astype(jnp.float32),
    }


def _choose_tb(batch, seq_len):
    """Fused batch elements per grid step: target >= 128 rows (fills the MXU M
    dim on v5e, approaches 256 on v6e/v7x) but keep >= 2 grid steps when the
    batch allows so both v7x TensorCores get work on the 'parallel' axis."""
    tb = max(1, min(batch, -(-128 // seq_len)))     # ceil(128 / L), capped at B
    while batch % tb:
        tb -= 1
    if batch // tb < 2 and batch >= 2:
        tb = max(1, batch // 2)
        while batch % tb:
            tb -= 1
    return tb


def multi_head_attention(q, k, v, prepared, n_head):
    """q, k, v: [B, L, D] float32.  prepared: output of prepare_params()."""
    B, L, D = q.shape
    d_head = D // n_head
    tb = _choose_tb(B, L)
    m_rows = tb * L

    # Flatten batch rows on the host (free reshape) so the kernel works on
    # lane-dense (M, D) row chunks.
    q2 = q.reshape(B * L, D)
    k2 = k.reshape(B * L, D)
    v2 = v.reshape(B * L, D)

    row_spec = pl.BlockSpec((m_rows, D), lambda i: (i, 0))
    w_spec = pl.BlockSpec((D, D), lambda i: (0, 0))
    b_spec = pl.BlockSpec((1, D), lambda i: (0, 0))
    # NOTE(v7x): for large d_model, mark the constant-index weight specs
    # pipeline_mode=pl.Buffered(1) (their block index never changes) and redo
    # the residency math for 64 MiB VMEM.

    kernel = functools.partial(mha_kernel, n_head=n_head, d_head=d_head,
                               tb=tb, seq_len=L)

    out2 = pl.pallas_call(
        kernel,
        out_shape=jax.ShapeDtypeStruct((B * L, D), q.dtype),
        grid=(B // tb,),
        in_specs=[row_spec, row_spec, row_spec,
                  w_spec, b_spec, w_spec, b_spec, w_spec, b_spec,
                  w_spec, b_spec],
        out_specs=row_spec,
        compiler_params=pltpu.CompilerParams(
            dimension_semantics=("parallel",),
            vmem_limit_bytes=32 * 1024 * 1024),
    )(q2, k2, v2,
      prepared["wq"], prepared["bq"], prepared["wk"], prepared["bk"],
      prepared["wv"], prepared["bv"], prepared["wc"], prepared["bc"])

    return out2.reshape(B, L, D)


def _reference(q, k, v, params, n_head):
    """Pure-JAX f32 reference mirroring the PyTorch module."""
    B, L, D = q.shape
    dh = D // n_head

    def lin(x, wb):
        w, b = wb
        return x @ w.T + b

    def split(t):
        return t.reshape(B, L, n_head, dh).transpose(0, 2, 1, 3)  # [B,H,L,dh]

    qp, kp, vp = (split(lin(q, params["w_q"])),
                  split(lin(k, params["w_k"])),
                  split(lin(v, params["w_v"])))
    score = (qp @ jnp.swapaxes(kp, 2, 3)) / math.sqrt(dh)
    score = jax.nn.softmax(score, axis=-1)
    out = score @ vp                                              # [B,H,L,dh]
    out = out.transpose(0, 2, 1, 3).reshape(B, L, D)
    return lin(out, params["w_concat"])


if __name__ == "__main__":
    B, L, D, H = 2, 8, 32, 4

    key = jax.random.PRNGKey(0)
    keys = jax.random.split(key, 12)

    def init_linear(kw, kb, d):
        bound = 1.0 / math.sqrt(d)
        w = jax.random.uniform(kw, (d, d), jnp.float32, -bound, bound)
        b = jax.random.uniform(kb, (d,), jnp.float32, -bound, bound)
        return (w, b)

    params = {
        "w_q": init_linear(keys[0], keys[1], D),
        "w_k": init_linear(keys[2], keys[3], D),
        "w_v": init_linear(keys[4], keys[5], D),
        "w_concat": init_linear(keys[6], keys[7], D),
    }

    q = jax.random.normal(keys[8], (B, L, D), jnp.float32)
    k = jax.random.normal(keys[9], (B, L, D), jnp.float32)
    v = jax.random.normal(keys[10], (B, L, D), jnp.float32)

    prepared = prepare_params(params, H)          # one-time weight prep

    out = multi_head_attention(q, k, v, prepared, H)
    out = jax.block_until_ready(out)

    ref = _reference(q, k, v, params, H)
    assert out.shape == (B, L, D)
    # bf16 MXU operands + approx reciprocal -> loosened tolerance vs f32 ref.
    assert jnp.allclose(out, ref, atol=5e-2, rtol=5e-2), (
        float(jnp.max(jnp.abs(out - ref))))

    print("KERNEL_OK")
</pallas_src>

<mosaic_0001>
module attributes {stable_mosaic.version = 11 : i64} {
  func.func @mha_kernel(%arg0: i32, %arg1: memref<8x32xf32, #tpu.memory_space<vmem>>, %arg2: memref<8x32xf32, #tpu.memory_space<vmem>>, %arg3: memref<8x32xf32, #tpu.memory_space<vmem>>, %arg4: memref<32x32xbf16, #tpu.memory_space<vmem>>, %arg5: memref<1x32xf32, #tpu.memory_space<vmem>>, %arg6: memref<32x32xbf16, #tpu.memory_space<vmem>>, %arg7: memref<1x32xf32, #tpu.memory_space<vmem>>, %arg8: memref<32x32xbf16, #tpu.memory_space<vmem>>, %arg9: memref<1x32xf32, #tpu.memory_space<vmem>>, %arg10: memref<32x32xbf16, #tpu.memory_space<vmem>>, %arg11: memref<1x32xf32, #tpu.memory_space<vmem>>, %arg12: memref<8x32xf32, #tpu.memory_space<vmem>>) attributes {dimension_semantics = [#tpu.dimension_semantics<parallel>], iteration_bounds = array<i64: 2>, scalar_prefetch = 0 : i64, scratch_operands = 0 : i64, tpu.core_type = #tpu.core_type<tc>, window_params = [{transform_indices = @transform_0, window_bounds = array<i64: 8, 32>}, {transform_indices = @transform_1, window_bounds = array<i64: 8, 32>}, {transform_indices = @transform_2, window_bounds = array<i64: 8, 32>}, {pipeline_mode = #tpu.pipeline_mode<synchronous>, transform_indices = @transform_3, window_bounds = array<i64: 32, 32>}, {pipeline_mode = #tpu.pipeline_mode<synchronous>, transform_indices = @transform_4, window_bounds = array<i64: 1, 32>}, {pipeline_mode = #tpu.pipeline_mode<synchronous>, transform_indices = @transform_5, window_bounds = array<i64: 32, 32>}, {pipeline_mode = #tpu.pipeline_mode<synchronous>, transform_indices = @transform_6, window_bounds = array<i64: 1, 32>}, {pipeline_mode = #tpu.pipeline_mode<synchronous>, transform_indices = @transform_7, window_bounds = array<i64: 32, 32>}, {pipeline_mode = #tpu.pipeline_mode<synchronous>, transform_indices = @transform_8, window_bounds = array<i64: 1, 32>}, {pipeline_mode = #tpu.pipeline_mode<synchronous>, transform_indices = @transform_9, window_bounds = array<i64: 32, 32>}, {pipeline_mode = #tpu.pipeline_mode<synchronous>, transform_indices = @transform_10, window_bounds = array<i64: 1, 32>}, {transform_indices = @transform_11, window_bounds = array<i64: 8, 32>}]} {
    %c0 = arith.constant 0 : index
    %c0_0 = arith.constant 0 : index
    %0 = vector.load %arg1[%c0, %c0_0] : memref<8x32xf32, #tpu.memory_space<vmem>>, vector<8x32xf32>
    %1 = arith.truncf %0 : vector<8x32xf32> to vector<8x32xbf16>
    %c0_1 = arith.constant 0 : index
    %c0_2 = arith.constant 0 : index
    %2 = vector.load %arg2[%c0_1, %c0_2] : memref<8x32xf32, #tpu.memory_space<vmem>>, vector<8x32xf32>
    %3 = arith.truncf %2 : vector<8x32xf32> to vector<8x32xbf16>
    %c0_3 = arith.constant 0 : index
    %c0_4 = arith.constant 0 : index
    %4 = vector.load %arg3[%c0_3, %c0_4] : memref<8x32xf32, #tpu.memory_space<vmem>>, vector<8x32xf32>
    %5 = arith.truncf %4 : vector<8x32xf32> to vector<8x32xbf16>
    %c0_5 = arith.constant 0 : index
    %c0_6 = arith.constant 0 : index
    %6 = vector.load %arg4[%c0_5, %c0_6] : memref<32x32xbf16, #tpu.memory_space<vmem>>, vector<32x32xbf16>
    %cst = arith.constant dense<0.000000e+00> : vector<8x32xf32>
    %7 = tpu.matmul %1, %6, %cst {dimension_numbers = #tpu.dot_dimension_numbers<[1], [0], [0], [1], [0, 0, 1, 1], [], []>} : vector<8x32xbf16>, vector<32x32xbf16>, vector<8x32xf32> -> vector<8x32xf32>
    %c0_7 = arith.constant 0 : index
    %c0_8 = arith.constant 0 : index
    %8 = vector.load %arg5[%c0_7, %c0_8] : memref<1x32xf32, #tpu.memory_space<vmem>>, vector<1x32xf32>
    %9 = vector.broadcast %8 : vector<1x32xf32> to vector<8x32xf32>
    %10 = arith.addf %7, %9 : vector<8x32xf32>
    %11 = arith.truncf %10 : vector<8x32xf32> to vector<8x32xbf16>
    %c0_9 = arith.constant 0 : index
    %c0_10 = arith.constant 0 : index
    %12 = vector.load %arg6[%c0_9, %c0_10] : memref<32x32xbf16, #tpu.memory_space<vmem>>, vector<32x32xbf16>
    %cst_11 = arith.constant dense<0.000000e+00> : vector<8x32xf32>
    %13 = tpu.matmul %3, %12, %cst_11 {dimension_numbers = #tpu.dot_dimension_numbers<[1], [0], [0], [1], [0, 0, 1, 1], [], []>} : vector<8x32xbf16>, vector<32x32xbf16>, vector<8x32xf32> -> vector<8x32xf32>
    %c0_12 = arith.constant 0 : index
    %c0_13 = arith.constant 0 : index
    %14 = vector.load %arg7[%c0_12, %c0_13] : memref<1x32xf32, #tpu.memory_space<vmem>>, vector<1x32xf32>
    %15 = vector.broadcast %14 : vector<1x32xf32> to vector<8x32xf32>
    %16 = arith.addf %13, %15 : vector<8x32xf32>
    %17 = arith.truncf %16 : vector<8x32xf32> to vector<8x32xbf16>
    %c0_14 = arith.constant 0 : index
    %c0_15 = arith.constant 0 : index
    %18 = vector.load %arg8[%c0_14, %c0_15] : memref<32x32xbf16, #tpu.memory_space<vmem>>, vector<32x32xbf16>
    %cst_16 = arith.constant dense<0.000000e+00> : vector<8x32xf32>
    %19 = tpu.matmul %5, %18, %cst_16 {dimension_numbers = #tpu.dot_dimension_numbers<[1], [0], [0], [1], [0, 0, 1, 1], [], []>} : vector<8x32xbf16>, vector<32x32xbf16>, vector<8x32xf32> -> vector<8x32xf32>
    %c0_17 = arith.constant 0 : index
    %c0_18 = arith.constant 0 : index
    %20 = vector.load %arg9[%c0_17, %c0_18] : memref<1x32xf32, #tpu.memory_space<vmem>>, vector<1x32xf32>
    %21 = vector.broadcast %20 : vector<1x32xf32> to vector<8x32xf32>
    %22 = arith.addf %19, %21 : vector<8x32xf32>
    %23 = arith.truncf %22 : vector<8x32xf32> to vector<8x32xbf16>
    %cst_19 = arith.constant 0.000000e+00 : f32
    %24 = vector.broadcast %cst_19 : f32 to vector<8x32xf32>
    %25 = vector.extract_strided_slice %11 {offsets = [0, 0], sizes = [8, 8], strides = [1, 1]} : vector<8x32xbf16> to vector<8x8xbf16>
    %26 = vector.shape_cast %25 : vector<8x8xbf16> to vector<1x8x8xbf16>
    %27 = vector.extract_strided_slice %17 {offsets = [0, 0], sizes = [8, 8], strides = [1, 1]} : vector<8x32xbf16> to vector<8x8xbf16>
    %28 = vector.shape_cast %27 : vector<8x8xbf16> to vector<1x8x8xbf16>
    %29 = vector.extract_strided_slice %23 {offsets = [0, 0], sizes = [8, 8], strides = [1, 1]} : vector<8x32xbf16> to vector<8x8xbf16>
    %30 = vector.shape_cast %29 : vector<8x8xbf16> to vector<1x8x8xbf16>
    "tpu.trace_start"() <{level = 10 : i32, message = "bqd,bkd->bqk"}> : () -> ()
    %cst_20 = arith.constant dense<0.000000e+00> : vector<1x8x8xf32>
    %31 = tpu.matmul %26, %28, %cst_20 {dimension_numbers = #tpu.dot_dimension_numbers<[2], [2], [1], [1], [0, 0, 0, 1, 1, 1], [0], [0]>} : vector<1x8x8xbf16>, vector<1x8x8xbf16>, vector<1x8x8xf32> -> vector<1x8x8xf32>
    "tpu.trace_stop"() : () -> ()
    %cst_21 = arith.constant dense<0xFF800000> : vector<1x8xf32>
    %32 = vector.multi_reduction <maximumf>, %31, %cst_21 [2] : vector<1x8x8xf32> to vector<1x8xf32>
    %33 = vector.shape_cast %32 : vector<1x8xf32> to vector<1x8x1xf32>
    %34 = vector.broadcast %33 : vector<1x8x1xf32> to vector<1x8x8xf32>
    %35 = arith.subf %31, %34 : vector<1x8x8xf32>
    %36 = math.exp %35 : vector<1x8x8xf32>
    %cst_22 = arith.constant dense<0.000000e+00> : vector<1x8xf32>
    %37 = vector.multi_reduction <add>, %36, %cst_22 [2] : vector<1x8x8xf32> to vector<1x8xf32>
    %38 = vector.shape_cast %37 : vector<1x8xf32> to vector<1x8x1xf32>
    %39 = arith.truncf %36 : vector<1x8x8xf32> to vector<1x8x8xbf16>
    "tpu.trace_start"() <{level = 10 : i32, message = "bqk,bkd->bqd"}> : () -> ()
    %cst_23 = arith.constant dense<0.000000e+00> : vector<1x8x8xf32>
    %40 = tpu.matmul %39, %30, %cst_23 {dimension_numbers = #tpu.dot_dimension_numbers<[2], [1], [1], [2], [0, 0, 0, 1, 1, 2], [0], [0]>} : vector<1x8x8xbf16>, vector<1x8x8xbf16>, vector<1x8x8xf32> -> vector<1x8x8xf32>
    "tpu.trace_stop"() : () -> ()
    %41 = tpu.reciprocal %38 {approx = true} : vector<1x8x1xf32> -> vector<1x8x1xf32>
    %42 = vector.broadcast %41 : vector<1x8x1xf32> to vector<1x8x8xf32>
    %43 = arith.mulf %40, %42 : vector<1x8x8xf32>
    %44 = vector.shape_cast %43 : vector<1x8x8xf32> to vector<8x8xf32>
    %45 = arith.truncf %44 : vector<8x8xf32> to vector<8x8xbf16>
    %c0_24 = arith.constant 0 : index
    %c0_25 = arith.constant 0 : index
    %46 = vector.load %arg10[%c0_24, %c0_25] : memref<32x32xbf16, #tpu.memory_space<vmem>>, vector<8x32xbf16>
    %cst_26 = arith.constant dense<0.000000e+00> : vector<8x32xf32>
    %47 = tpu.matmul %45, %46, %cst_26 {dimension_numbers = #tpu.dot_dimension_numbers<[1], [0], [0], [1], [0, 0, 1, 1], [], []>} : vector<8x8xbf16>, vector<8x32xbf16>, vector<8x32xf32> -> vector<8x32xf32>
    %48 = arith.addf %24, %47 : vector<8x32xf32>
    %49 = vector.extract_strided_slice %11 {offsets = [0, 8], sizes = [8, 8], strides = [1, 1]} : vector<8x32xbf16> to vector<8x8xbf16>
    %50 = vector.shape_cast %49 : vector<8x8xbf16> to vector<1x8x8xbf16>
    %51 = vector.extract_strided_slice %17 {offsets = [0, 8], sizes = [8, 8], strides = [1, 1]} : vector<8x32xbf16> to vector<8x8xbf16>
    %52 = vector.shape_cast %51 : vector<8x8xbf16> to vector<1x8x8xbf16>
    %53 = vector.extract_strided_slice %23 {offsets = [0, 8], sizes = [8, 8], strides = [1, 1]} : vector<8x32xbf16> to vector<8x8xbf16>
    %54 = vector.shape_cast %53 : vector<8x8xbf16> to vector<1x8x8xbf16>
    "tpu.trace_start"() <{level = 10 : i32, message = "bqd,bkd->bqk"}> : () -> ()
    %cst_27 = arith.constant dense<0.000000e+00> : vector<1x8x8xf32>
    %55 = tpu.matmul %50, %52, %cst_27 {dimension_numbers = #tpu.dot_dimension_numbers<[2], [2], [1], [1], [0, 0, 0, 1, 1, 1], [0], [0]>} : vector<1x8x8xbf16>, vector<1x8x8xbf16>, vector<1x8x8xf32> -> vector<1x8x8xf32>
    "tpu.trace_stop"() : () -> ()
    %cst_28 = arith.constant dense<0xFF800000> : vector<1x8xf32>
    %56 = vector.multi_reduction <maximumf>, %55, %cst_28 [2] : vector<1x8x8xf32> to vector<1x8xf32>
    %57 = vector.shape_cast %56 : vector<1x8xf32> to vector<1x8x1xf32>
    %58 = vector.broadcast %57 : vector<1x8x1xf32> to vector<1x8x8xf32>
    %59 = arith.subf %55, %58 : vector<1x8x8xf32>
    %60 = math.exp %59 : vector<1x8x8xf32>
    %cst_29 = arith.constant dense<0.000000e+00> : vector<1x8xf32>
    %61 = vector.multi_reduction <add>, %60, %cst_29 [2] : vector<1x8x8xf32> to vector<1x8xf32>
    %62 = vector.shape_cast %61 : vector<1x8xf32> to vector<1x8x1xf32>
    %63 = arith.truncf %60 : vector<1x8x8xf32> to vector<1x8x8xbf16>
    "tpu.trace_start"() <{level = 10 : i32, message = "bqk,bkd->bqd"}> : () -> ()
    %cst_30 = arith.constant dense<0.000000e+00> : vector<1x8x8xf32>
    %64 = tpu.matmul %63, %54, %cst_30 {dimension_numbers = #tpu.dot_dimension_numbers<[2], [1], [1], [2], [0, 0, 0, 1, 1, 2], [0], [0]>} : vector<1x8x8xbf16>, vector<1x8x8xbf16>, vector<1x8x8xf32> -> vector<1x8x8xf32>
    "tpu.trace_stop"() : () -> ()
    %65 = tpu.reciprocal %62 {approx = true} : vector<1x8x1xf32> -> vector<1x8x1xf32>
    %66 = vector.broadcast %65 : vector<1x8x1xf32> to vector<1x8x8xf32>
    %67 = arith.mulf %64, %66 : vector<1x8x8xf32>
    %68 = vector.shape_cast %67 : vector<1x8x8xf32> to vector<8x8xf32>
    %69 = arith.truncf %68 : vector<8x8xf32> to vector<8x8xbf16>
    %c8 = arith.constant 8 : index
    %c0_31 = arith.constant 0 : index
    %70 = vector.load %arg10[%c8, %c0_31] : memref<32x32xbf16, #tpu.memory_space<vmem>>, vector<8x32xbf16>
    %cst_32 = arith.constant dense<0.000000e+00> : vector<8x32xf32>
    %71 = tpu.matmul %69, %70, %cst_32 {dimension_numbers = #tpu.dot_dimension_numbers<[1], [0], [0], [1], [0, 0, 1, 1], [], []>} : vector<8x8xbf16>, vector<8x32xbf16>, vector<8x32xf32> -> vector<8x32xf32>
    %72 = arith.addf %48, %71 : vector<8x32xf32>
    %73 = vector.extract_strided_slice %11 {offsets = [0, 16], sizes = [8, 8], strides = [1, 1]} : vector<8x32xbf16> to vector<8x8xbf16>
    %74 = vector.shape_cast %73 : vector<8x8xbf16> to vector<1x8x8xbf16>
    %75 = vector.extract_strided_slice %17 {offsets = [0, 16], sizes = [8, 8], strides = [1, 1]} : vector<8x32xbf16> to vector<8x8xbf16>
    %76 = vector.shape_cast %75 : vector<8x8xbf16> to vector<1x8x8xbf16>
    %77 = vector.extract_strided_slice %23 {offsets = [0, 16], sizes = [8, 8], strides = [1, 1]} : vector<8x32xbf16> to vector<8x8xbf16>
    %78 = vector.shape_cast %77 : vector<8x8xbf16> to vector<1x8x8xbf16>
    "tpu.trace_start"() <{level = 10 : i32, message = "bqd,bkd->bqk"}> : () -> ()
    %cst_33 = arith.constant dense<0.000000e+00> : vector<1x8x8xf32>
    %79 = tpu.matmul %74, %76, %cst_33 {dimension_numbers = #tpu.dot_dimension_numbers<[2], [2], [1], [1], [0, 0, 0, 1, 1, 1], [0], [0]>} : vector<1x8x8xbf16>, vector<1x8x8xbf16>, vector<1x8x8xf32> -> vector<1x8x8xf32>
    "tpu.trace_stop"() : () -> ()
    %cst_34 = arith.constant dense<0xFF800000> : vector<1x8xf32>
    %80 = vector.multi_reduction <maximumf>, %79, %cst_34 [2] : vector<1x8x8xf32> to vector<1x8xf32>
    %81 = vector.shape_cast %80 : vector<1x8xf32> to vector<1x8x1xf32>
    %82 = vector.broadcast %81 : vector<1x8x1xf32> to vector<1x8x8xf32>
    %83 = arith.subf %79, %82 : vector<1x8x8xf32>
    %84 = math.exp %83 : vector<1x8x8xf32>
    %cst_35 = arith.constant dense<0.000000e+00> : vector<1x8xf32>
    %85 = vector.multi_reduction <add>, %84, %cst_35 [2] : vector<1x8x8xf32> to vector<1x8xf32>
    %86 = vector.shape_cast %85 : vector<1x8xf32> to vector<1x8x1xf32>
    %87 = arith.truncf %84 : vector<1x8x8xf32> to vector<1x8x8xbf16>
    "tpu.trace_start"() <{level = 10 : i32, message = "bqk,bkd->bqd"}> : () -> ()
    %cst_36 = arith.constant dense<0.000000e+00> : vector<1x8x8xf32>
    %88 = tpu.matmul %87, %78, %cst_36 {dimension_numbers = #tpu.dot_dimension_numbers<[2], [1], [1], [2], [0, 0, 0, 1, 1, 2], [0], [0]>} : vector<1x8x8xbf16>, vector<1x8x8xbf16>, vector<1x8x8xf32> -> vector<1x8x8xf32>
    "tpu.trace_stop"() : () -> ()
    %89 = tpu.reciprocal %86 {approx = true} : vector<1x8x1xf32> -> vector<1x8x1xf32>
    %90 = vector.broadcast %89 : vector<1x8x1xf32> to vector<1x8x8xf32>
    %91 = arith.mulf %88, %90 : vector<1x8x8xf32>
    %92 = vector.shape_cast %91 : vector<1x8x8xf32> to vector<8x8xf32>
    %93 = arith.truncf %92 : vector<8x8xf32> to vector<8x8xbf16>
    %c16 = arith.constant 16 : index
    %c0_37 = arith.constant 0 : index
    %94 = vector.load %arg10[%c16, %c0_37] : memref<32x32xbf16, #tpu.memory_space<vmem>>, vector<8x32xbf16>
    %cst_38 = arith.constant dense<0.000000e+00> : vector<8x32xf32>
    %95 = tpu.matmul %93, %94, %cst_38 {dimension_numbers = #tpu.dot_dimension_numbers<[1], [0], [0], [1], [0, 0, 1, 1], [], []>} : vector<8x8xbf16>, vector<8x32xbf16>, vector<8x32xf32> -> vector<8x32xf32>
    %96 = arith.addf %72, %95 : vector<8x32xf32>
    %97 = vector.extract_strided_slice %11 {offsets = [0, 24], sizes = [8, 8], strides = [1, 1]} : vector<8x32xbf16> to vector<8x8xbf16>
    %98 = vector.shape_cast %97 : vector<8x8xbf16> to vector<1x8x8xbf16>
    %99 = vector.extract_strided_slice %17 {offsets = [0, 24], sizes = [8, 8], strides = [1, 1]} : vector<8x32xbf16> to vector<8x8xbf16>
    %100 = vector.shape_cast %99 : vector<8x8xbf16> to vector<1x8x8xbf16>
    %101 = vector.extract_strided_slice %23 {offsets = [0, 24], sizes = [8, 8], strides = [1, 1]} : vector<8x32xbf16> to vector<8x8xbf16>
    %102 = vector.shape_cast %101 : vector<8x8xbf16> to vector<1x8x8xbf16>
    "tpu.trace_start"() <{level = 10 : i32, message = "bqd,bkd->bqk"}> : () -> ()
    %cst_39 = arith.constant dense<0.000000e+00> : vector<1x8x8xf32>
    %103 = tpu.matmul %98, %100, %cst_39 {dimension_numbers = #tpu.dot_dimension_numbers<[2], [2], [1], [1], [0, 0, 0, 1, 1, 1], [0], [0]>} : vector<1x8x8xbf16>, vector<1x8x8xbf16>, vector<1x8x8xf32> -> vector<1x8x8xf32>
    "tpu.trace_stop"() : () -> ()
    %cst_40 = arith.constant dense<0xFF800000> : vector<1x8xf32>
    %104 = vector.multi_reduction <maximumf>, %103, %cst_40 [2] : vector<1x8x8xf32> to vector<1x8xf32>
    %105 = vector.shape_cast %104 : vector<1x8xf32> to vector<1x8x1xf32>
    %106 = vector.broadcast %105 : vector<1x8x1xf32> to vector<1x8x8xf32>
    %107 = arith.subf %103, %106 : vector<1x8x8xf32>
    %108 = math.exp %107 : vector<1x8x8xf32>
    %cst_41 = arith.constant dense<0.000000e+00> : vector<1x8xf32>
    %109 = vector.multi_reduction <add>, %108, %cst_41 [2] : vector<1x8x8xf32> to vector<1x8xf32>
    %110 = vector.shape_cast %109 : vector<1x8xf32> to vector<1x8x1xf32>
    %111 = arith.truncf %108 : vector<1x8x8xf32> to vector<1x8x8xbf16>
    "tpu.trace_start"() <{level = 10 : i32, message = "bqk,bkd->bqd"}> : () -> ()
    %cst_42 = arith.constant dense<0.000000e+00> : vector<1x8x8xf32>
    %112 = tpu.matmul %111, %102, %cst_42 {dimension_numbers = #tpu.dot_dimension_numbers<[2], [1], [1], [2], [0, 0, 0, 1, 1, 2], [0], [0]>} : vector<1x8x8xbf16>, vector<1x8x8xbf16>, vector<1x8x8xf32> -> vector<1x8x8xf32>
    "tpu.trace_stop"() : () -> ()
    %113 = tpu.reciprocal %110 {approx = true} : vector<1x8x1xf32> -> vector<1x8x1xf32>
    %114 = vector.broadcast %113 : vector<1x8x1xf32> to vector<1x8x8xf32>
    %115 = arith.mulf %112, %114 : vector<1x8x8xf32>
    %116 = vector.shape_cast %115 : vector<1x8x8xf32> to vector<8x8xf32>
    %117 = arith.truncf %116 : vector<8x8xf32> to vector<8x8xbf16>
    %c24 = arith.constant 24 : index
    %c0_43 = arith.constant 0 : index
    %118 = vector.load %arg10[%c24, %c0_43] : memref<32x32xbf16, #tpu.memory_space<vmem>>, vector<8x32xbf16>
    %cst_44 = arith.constant dense<0.000000e+00> : vector<8x32xf32>
    %119 = tpu.matmul %117, %118, %cst_44 {dimension_numbers = #tpu.dot_dimension_numbers<[1], [0], [0], [1], [0, 0, 1, 1], [], []>} : vector<8x8xbf16>, vector<8x32xbf16>, vector<8x32xf32> -> vector<8x32xf32>
    %120 = arith.addf %96, %119 : vector<8x32xf32>
    %c0_45 = arith.constant 0 : index
    %c0_46 = arith.constant 0 : index
    %121 = vector.load %arg11[%c0_45, %c0_46] : memref<1x32xf32, #tpu.memory_space<vmem>>, vector<1x32xf32>
    %122 = vector.broadcast %121 : vector<1x32xf32> to vector<8x32xf32>
    %123 = arith.addf %120, %122 : vector<8x32xf32>
    %c0_47 = arith.constant 0 : index
    %c0_48 = arith.constant 0 : index
    %124 = vector.load %arg12[%c0_47, %c0_48] : memref<8x32xf32, #tpu.memory_space<vmem>>, vector<8x32xf32>
    tpu.vector_store %arg12[%c0_47, %c0_48], %123 {strides = array<i32>} : memref<8x32xf32, #tpu.memory_space<vmem>>, vector<8x32xf32>,
    return
  }
  func.func @transform_0(%arg0: i32) -> (i32, i32) {
    %c0_i32 = arith.constant 0 : i32
    %c0_i32_0 = arith.constant 0 : i32
    return %arg0, %c0_i32 : i32, i32
  }
  func.func @transform_1(%arg0: i32) -> (i32, i32) {
    %c0_i32 = arith.constant 0 : i32
    %c0_i32_0 = arith.constant 0 : i32
    return %arg0, %c0_i32 : i32, i32
  }
  func.func @transform_2(%arg0: i32) -> (i32, i32) {
    %c0_i32 = arith.constant 0 : i32
    %c0_i32_0 = arith.constant 0 : i32
    return %arg0, %c0_i32 : i32, i32
  }
  func.func @transform_3(%arg0: i32) -> (i32, i32) {
    %c0_i32 = arith.constant 0 : i32
    %c0_i32_0 = arith.constant 0 : i32
    %c0_i32_1 = arith.constant 0 : i32
    return %c0_i32, %c0_i32_0 : i32, i32
  }
  func.func @transform_4(%arg0: i32) -> (i32, i32) {
    %c0_i32 = arith.constant 0 : i32
    %c0_i32_0 = arith.constant 0 : i32
    %c0_i32_1 = arith.constant 0 : i32
    return %c0_i32, %c0_i32_0 : i32, i32
  }
  func.func @transform_5(%arg0: i32) -> (i32, i32) {
    %c0_i32 = arith.constant 0 : i32
    %c0_i32_0 = arith.constant 0 : i32
    %c0_i32_1 = arith.constant 0 : i32
    return %c0_i32, %c0_i32_0 : i32, i32
  }
  func.func @transform_6(%arg0: i32) -> (i32, i32) {
    %c0_i32 = arith.constant 0 : i32
    %c0_i32_0 = arith.constant 0 : i32
    %c0_i32_1 = arith.constant 0 : i32
    return %c0_i32, %c0_i32_0 : i32, i32
  }
  func.func @transform_7(%arg0: i32) -> (i32, i32) {
    %c0_i32 = arith.constant 0 : i32
    %c0_i32_0 = arith.constant 0 : i32
    %c0_i32_1 = arith.constant 0 : i32
    return %c0_i32, %c0_i32_0 : i32, i32
  }
  func.func @transform_8(%arg0: i32) -> (i32, i32) {
    %c0_i32 = arith.constant 0 : i32
    %c0_i32_0 = arith.constant 0 : i32
    %c0_i32_1 = arith.constant 0 : i32
    return %c0_i32, %c0_i32_0 : i32, i32
  }
  func.func @transform_9(%arg0: i32) -> (i32, i32) {
    %c0_i32 = arith.constant 0 : i32
    %c0_i32_0 = arith.constant 0 : i32
    %c0_i32_1 = arith.constant 0 : i32
    return %c0_i32, %c0_i32_0 : i32, i32
  }
  func.func @transform_10(%arg0: i32) -> (i32, i32) {
    %c0_i32 = arith.constant 0 : i32
    %c0_i32_0 = arith.constant 0 : i32
    %c0_i32_1 = arith.constant 0 : i32
    return %c0_i32, %c0_i32_0 : i32, i32
  }
  func.func @transform_11(%arg0: i32) -> (i32, i32) {
    %c0_i32 = arith.constant 0 : i32
    %c0_i32_0 = arith.constant 0 : i32
    return %arg0, %c0_i32 : i32, i32
  }
}

</mosaic_0001>

<bundles_post_ra>
// kernel: tpu_custom_call.1
= control target key start
LH: loop header
LB: loop body
LE: loop exit
PB: predicated region body
PF: predicated region fallthrough
CT: control target
= control target key end

     0   :  { %s2616_s0 = inlined_call_operand.hbm [shape: f32[16,32], index: 0, kind: input, shape index: {}]   ;;  %s2617_s1 = inlined_call_operand.hbm [shape: f32[16,32], index: 1, kind: input, shape index: {}]   ;;  %s2618_s2 = inlined_call_operand.hbm [shape: f32[16,32], index: 2, kind: input, shape index: {}]   ;;  %s2619_s3 = inlined_call_operand.hbm [shape: bf16[32,32], index: 3, kind: input, shape index: {}]   ;;  %s2620_s4 = inlined_call_operand.vmem [shape: f32[1,32], index: 4, kind: input, shape index: {}]   ;;  %s2621_s5 = inlined_call_operand.vmem [shape: bf16[32,32], index: 5, kind: input, shape index: {}]   ;;  %s2622_s6 = inlined_call_operand.vmem [shape: f32[1,32], index: 6, kind: input, shape index: {}]   ;;  %s2623_s7 = inlined_call_operand.hbm [shape: bf16[32,32], index: 7, kind: input, shape index: {}]   ;;  %s2624_s8 = inlined_call_operand.hbm [shape: f32[1,32], index: 8, kind: input, shape index: {}]   ;;  %s2625_s9 = inlined_call_operand.vmem [shape: bf16[32,32], index: 9, kind: input, shape index: {}]   ;;  %s2626_s10 = inlined_call_operand.vmem [shape: f32[1,32], index: 10, kind: input, shape index: {}]   ;;  %s2627_s11 = inlined_call_operand.hbm [shape: f32[16,32], index: 11, kind: output, shape index: {}]  }
   0x1   :  { %2652 = sst [smem:[#allocation25_spill]] %s2617_s1 }
   0x2   :  { %2653 = sst [smem:[#allocation26_spill]] %s2619_s3 }
   0x3   :  { %2654 = sst [smem:[#allocation27_spill]] %s2620_s4 }
   0x4   :  { %2655 = sst [smem:[#allocation28_spill]] %s2625_s9 }
   0x5   :  { %2656 = sst [smem:[#allocation29_spill]] %s2626_s10 }
   0x6   :  { %2657 = sst [smem:[#allocation30_spill]] %s2627_s11 }
   0x7   :  { %16 = vsyncpa [#allocation3], 0 }
   0x8   :  { %18 = vsyncpa [#allocation3 + $0x1], 0 }
   0x9   :  { %19 = vsyncpa [#allocation6], 0 }
   0xa   :  { %21 = vsyncpa [#allocation6 + $0x1], 0 }
   0xb   :  { %22 = vsyncpa [#allocation9], 0 }
   0xc   :  { %23 = vsyncpa [#allocation12], 0 }
   0xd   :  { %24 = vsyncpa [#allocation4], 0 }
   0xe   :  { %26 = vsyncpa [#allocation4 + $0x1], 0  ;;  %s2144_s17 = smov 0   ;;  %s2146_s18 = smov 0  }
   0xf   :  { %s2148_s19 = smov 0   ;;  %s2150_s20 = smov 0  }
  0x10 LB: > { %2658 = sst [smem:[#allocation19_spill]] %s2056_s17  ;;  %s2165_s21 = sadd.s32 4294967295, %s2068_s20   ;;  %s2068_s20 = sphi %s2150_s20, %s2700_s20   ;;  %s2064_s19 = sphi %s2148_s19, %s2704_s19   ;;  %s2060_s18 = sphi %s2146_s18, %s2703_s18   ;;  %s2056_s17 = sphi %s2144_s17, %s2702_s17  }
  0x11   : > { %2659 = sst [smem:[#allocation20_spill]] %s2068_s20  ;;  %s1522_s22 = sadd.s32 4294967294, %s2068_s20  }
  0x12   : > { %p52_p0 = scmp.ne.s32.totalorder %s2060_s18, %s2056_s17  ;;  %p2630_p1 = scmp.eq.s32.totalorder %s2165_s21, 0 }
  0x13   : > { %p302_p3 = scmp.eq.s32.totalorder %s1522_s22, 1  ;;  %p1523_p5 = scmp.ge.s32.totalorder %s2068_s20, 1 }
  0x14   : > { %p2174_p4 = por %p2630_p1, %p52_p0  ;;  %p309_p7 = scmp.lt.s32.totalorder %s2068_s20, 3 }
  0x15   : > { %p2179_p6 = por %p302_p3, %p52_p0  ;;  %s2070_s26 = smov [#allocation8]  }
  0x16   : > { %s2660_s23 = scalar_select %p2174_p4, 1, 0 }
  0x17   : > { %s2661_s24 = scalar_select %p2179_p6, 1, 0 }
  0x18   : > { %p2184_p8 = pnand %p1523_p5, %p309_p7  ;;  %s321_s27 = sshll.u32 %s2070_s26, 4  ;;  %s2188_s27 = int_to_ptr.vmem [resolvable:$true] %s321_s27 }
  0x19   : > { %2662 = sst [smem:[#allocation21_spill]] %s2661_s24  ;;  %s2200_s29 = sadd.s32 1, %s2068_s20  }
  0x1a   : > { %s2663_s25 = scalar_select %p2184_p8, 1, 0 }
  0x1b   : > { %p1720_p9 = pneg %p2184_p8  ;;  %2665 = sst [smem:[#allocation22_spill]] %s2200_s29 }
  0x1c   : > { %s39_s30 = sadd.s32 1, %s2064_s19  ;;  %s36_s12 = ssub.s32 %s2068_s20, %s2200_s29 }
  0x1d   : > { %p2195_p11 = pnand %p1720_p9, %p2630_p1  ;;  %s2666_s3 = sld [smem:[#allocation26_spill]] }
  0x1f   : > { %s2664_s28 = scalar_select %p2195_p11, 1, 0 }
  0x20   : > { %p2213_p13 = pneg %p2195_p11 }
  0x22   : > { %s2667_s26 = scalar_select %p2213_p13, 1, 0 }
  0x23   : > { %s1816_s15 = scalar_lea.hbm %s2666_s3, 256 }
  0x24   : > { %p1817_p12 = scmp.ne.s32.totalorder %s2666_s3, %s1816_s15  ;;  %p1823_p5 = scmp.lt.u32.totalorder %s1816_s15, %s2666_s3 }
  0x26   : > { %p1819_p0 = pnand %p2213_p13, %p1817_p12 }
  0x28   : > { %p1820_p3 = pneg %p1819_p0 }
  0x2a   : > { %p1825_p7 = pnand %p1823_p5, %p1820_p3 }
  0x2c   : > { %1828 = shalt.err (!%p1825_p7)
}
  0x2d   : > { %s1829_s13 = scalar_lea.vmem %s2188_s27, 256  ;;  %p1837_p2 = scmp.lt.s32.totalorder %s2188_s27, %s2188_s27 }
  0x2e   : > { %p1830_p9 = scmp.ne.s32.totalorder %s2188_s27, %s1829_s13  ;;  %p1838_p6 = scmp.lt.s32.totalorder %s1829_s13, %s1829_s13 }
  0x30   : > { %p1832_p10 = pnand %p1830_p9, %p2213_p13  ;;  %p1839_p12 = por %p1838_p6, %p1837_p2 }
  0x32   : > { %p1833_p1 = pneg %p1832_p10 }
  0x34   : > { %p1840_p0 = pnand %p1839_p12, %p1833_p1 }
  0x36   : > { %1843 = shalt.err (!%p1840_p0)
}
  0x37   : > { %s2634_s14 = smov 64   ;;  %s2635_s17 = smov 4  }
  0x38   : > { %1723 = dma.hbm_to_vmem [thread:$0]  (!%p2195_p11), %s2666_s3, 256, %s2188_s27, [#allocation9], %s2634_s14, %s2634_s14, %s2635_s17  }
  0x39   : > { %p37_p1 = scmp.eq.s32.totalorder %s36_s12, 0  ;;  %p46_p2 = scmp.ne.s32.totalorder %s2064_s19, %s2060_s18 }
  0x3a   : > { %p47_p6 = scmp.eq.s32.totalorder %s2068_s20, 0  ;;  %p1747_p10 = scmp.lt.s32.totalorder %s2068_s20, 2 }
  0x3b   : > { %s2242_s16 = scalar_select %p37_p1, %s2064_s19, %s39_s30  }
  0x3c   : > { %p48_p3 = por %p47_p6, %p46_p2  ;;  %p2669_p5 = scmp.eq.s32.totalorder %s2165_s21, 1 }
  0x3d   : > { %2668 = sst [smem:[#allocation23_spill]] %s2242_s16  ;;  %s2636_s13 = sand.u32 1, %s2064_s19  }
  0x3e   : > { %p2246_p7 = por %p2669_p5, %p46_p2  ;;  %s2252_s29 = sshll.u32 %s2068_s20, 7 }
  0x3f   : > { %s2256_s11 = sshll.u32 %s2636_s13, 3  ;;  %p2258_p9 = pnand %p1747_p10, %p48_p3 }
  0x40   : > { %s2670_s22 = scalar_select %p2246_p7, 1, 0 }
  0x41   : > { %s2672_s27 = scalar_select %p2258_p9, 1, 0 }
  0x42   : > { %2671 = sst [smem:[#allocation24_spill]] %s2670_s22  ;;  %s392_s30 = sand.u32 1, %s2068_s20  }
  0x43   : > { %s2673_s1 = sld [smem:[#allocation25_spill]]  ;;  %s396_s14 = scalar_lea.vmem [#allocation5], %s2256_s11 }
  0x44   : > { %s403_s17 = sshll.u32 %s396_s14, 4  ;;  %s2272_s13 = scalar_lea.sflag [#allocation6], %s392_s30  ;;  %s2270_s17 = int_to_ptr.vmem [resolvable:$true] %s403_s17 }
  0x45   : > { %p2278_p0 = pneg %p2258_p9 }
  0x47   : > { %s2674_s16 = scalar_select %p2278_p0, 1, 0 }
  0x49   : > { %s2267_s15 = scalar_lea.hbm %s2673_s1, %s2252_s29  ;;  %s1849_s20 = scalar_lea.hbm %s2673_s1, 256 }
  0x4a   : > { %s1844_s3 = scalar_lea.hbm %s2267_s15, 128  ;;  %p1850_p6 = scmp.lt.u32.totalorder %s2267_s15, %s2673_s1 }
  0x4b   : > { %p1845_p12 = scmp.ne.s32.totalorder %s2267_s15, %s1844_s3  ;;  %p1851_p10 = scmp.lt.u32.totalorder %s1849_s20, %s1844_s3 }
  0x4c   : > { %p1853_p5 = scmp.lt.u32.totalorder %s1844_s3, %s2267_s15 }
  0x4d   : > { %p1847_p1 = pnand %p2278_p0, %p1845_p12  ;;  %p1852_p3 = por %p1851_p10, %p1850_p6 }
  0x4f   : > { %p1848_p2 = pneg %p1847_p1  ;;  %p1854_p7 = por %p1853_p5, %p1852_p3 }
  0x51   : > { %p1855_p4 = pnand %p1854_p7, %p1848_p2 }
  0x53   : > { %1858 = shalt.err (!%p1855_p4)
}
  0x54   : > { %s1859_s30 = scalar_lea.vmem %s2270_s17, 128  ;;  %s2073_s12 = smov [#allocation5]  }
  0x55   : > { %p1860_p12 = scmp.ne.s32.totalorder %s2270_s17, %s1859_s30  ;;  %s1864_s24 = sshll.u32 %s2073_s12, 4  ;;  %s1865_s24 = int_to_ptr.vmem [resolvable:$false] %s1864_s24 }
  0x56   : > { %s1866_s22 = scalar_lea.vmem %s1865_s24, 256  ;;  %p1867_p11 = scmp.lt.s32.totalorder %s2270_s17, %s1865_s24 }
  0x57   : > { %p1862_p1 = pnand %p1860_p12, %p2278_p0  ;;  %p1868_p13 = scmp.lt.s32.totalorder %s1866_s22, %s1859_s30 }
  0x59   : > { %p1863_p8 = pneg %p1862_p1  ;;  %p1869_p6 = por %p1868_p13, %p1867_p11 }
  0x5b   : > { %p1870_p10 = pnand %p1869_p6, %p1863_p8 }
  0x5d   : > { %1873 = shalt.err (!%p1870_p10)
}
  0x5e   : > { %1736 = dma.hbm_to_vmem [thread:$0]  (!%p2258_p9), %s2267_s15, 128, %s2270_s17, %s2272_s13  }
  0x5f   : > { %s2074_s3 = smov [#allocation10]   ;;  %s2075_s14 = smov [#allocation11]  }
  0x60   : > { %s343_s20 = sshll.u32 %s2074_s3, 4  ;;  %s357_s1 = sshll.u32 %s2075_s14, 4  ;;  %s344_s20 = int_to_ptr.vmem [resolvable:$true] %s343_s20  ;;  %s358_s1 = int_to_ptr.vmem [resolvable:$true] %s357_s1 }
  0x61   : > { %s1874_s24 = scalar_lea.hbm %s2623_s7, 256  ;;  %p2675_p8 = scmp.ne.s32.totalorder %s2667_s26, 0 }
  0x62   : > { %p1875_p4 = scmp.ne.s32.totalorder %s2623_s7, %s1874_s24  ;;  %p1881_p7 = scmp.lt.u32.totalorder %s1874_s24, %s2623_s7 }
  0x64   : > { %p1877_p11 = pnand %p1875_p4, %p2675_p8 }
  0x66   : > { %p1878_p13 = pneg %p1877_p11 }
  0x68   : > { %p1883_p2 = pnand %p1881_p7, %p1878_p13 }
  0x6a   : > { %1886 = shalt.err (!%p1883_p2)
}
  0x6b   : > { %s1887_s17 = scalar_lea.vmem %s344_s20, 256  ;;  %p1895_p1 = scmp.lt.s32.totalorder %s344_s20, %s344_s20 }
  0x6c   : > { %p1888_p3 = scmp.ne.s32.totalorder %s344_s20, %s1887_s17  ;;  %p1896_p6 = scmp.lt.s32.totalorder %s1887_s17, %s1887_s17 }
  0x6e   : > { %p1890_p5 = pnand %p1888_p3, %p2675_p8  ;;  %p1897_p10 = por %p1896_p6, %p1895_p1 }
  0x70   : > { %p1891_p12 = pneg %p1890_p5 }
  0x72   : > { %p1898_p9 = pnand %p1897_p10, %p1891_p12 }
  0x74   : > { %1901 = shalt.err (!%p1898_p9)
}
  0x75   : > { %p2676_p4 = scmp.ne.s32.totalorder %s2664_s28, 0  ;;  %s2677_s10 = smov 4  }
  0x76   : > { %s2678_s15 = smov 64   ;;  %s1902_s12 = scalar_lea.hbm %s2624_s8, 16 }
  0x77   : > { %1726 = dma.hbm_to_vmem [thread:$0]  (!%p2676_p4), %s2623_s7, 256, %s344_s20, [#allocation9], %s2678_s15, %s2678_s15, %s2677_s10  }
  0x78   : > { %p1903_p11 = scmp.ne.s32.totalorder %s2624_s8, %s1902_s12  ;;  %p1909_p7 = scmp.lt.u32.totalorder %s1902_s12, %s2624_s8 }
  0x7a   : > { %p1905_p9 = pnand %p1903_p11, %p2675_p8 }
  0x7c   : > { %p1906_p13 = pneg %p1905_p9 }
  0x7e   : > { %p1911_p2 = pnand %p1909_p7, %p1906_p13 }
  0x80   : > { %1914 = shalt.err (!%p1911_p2)
}
  0x81   : > { %s1915_s4 = scalar_lea.vmem %s358_s1, 16  ;;  %s1922_s20 = scalar_lea.vmem %s358_s1, 32 }
  0x82   : > { %p1916_p3 = scmp.ne.s32.totalorder %s358_s1, %s1915_s4  ;;  %p1923_p1 = scmp.lt.s32.totalorder %s358_s1, %s358_s1 }
  0x83   : > { %p1924_p6 = scmp.lt.s32.totalorder %s1922_s20, %s1915_s4 }
  0x84   : > { %p1918_p5 = pnand %p1916_p3, %p2675_p8 }
  0x85   : > { %p1925_p10 = por %p1924_p6, %p1923_p1 }
  0x86   : > { %p1919_p12 = pneg %p1918_p5 }
  0x88   : > { %p1926_p0 = pnand %p1925_p10, %p1919_p12 }
  0x8a   : > { %1929 = shalt.err (!%p1926_p0)
}
  0x8b   : > { %1729 = dma.hbm_to_vmem [thread:$0]  (!%p2676_p4), %s2624_s8, 16, %s358_s1, [#allocation12]  }
  0x8c   : > { %s2345_s3 = scalar_lea.hbm %s2616_s0, %s2252_s29  ;;  %s378_s14 = scalar_lea.vmem [#allocation2], %s2256_s11 }
  0x8d   : > { %s385_s28 = sshll.u32 %s378_s14, 4  ;;  %s2354_s30 = scalar_lea.hbm %s2618_s2, %s2252_s29  ;;  %s2348_s28 = int_to_ptr.vmem [resolvable:$true] %s385_s28 }
  0x8e   : > { %s2679_s22 = sand.u32 1, %s2064_s19   ;;  %s1930_s17 = scalar_lea.hbm %s2345_s3, 128 }
  0x8f   : > { %s375_s1 = scalar_lea.sflag [#allocation3], %s2679_s22  ;;  %p1931_p0 = scmp.ne.s32.totalorder %s2345_s3, %s1930_s17 }
  0x90   : > { %p2680_p8 = scmp.ne.s32.totalorder %s2674_s16, 0  ;;  %s1935_s10 = scalar_lea.hbm %s2616_s0, 256 }
  0x91   : > { %p1936_p9 = scmp.lt.u32.totalorder %s2345_s3, %s2616_s0  ;;  %p1937_p13 = scmp.lt.u32.totalorder %s1935_s10, %s1930_s17 }
  0x92   : > { %p1933_p4 = pnand %p1931_p0, %p2680_p8  ;;  %p1939_p2 = scmp.lt.u32.totalorder %s1930_s17, %s2345_s3 }
  0x93   : > { %p1938_p7 = por %p1937_p13, %p1936_p9 }
  0x94   : > { %p1934_p11 = pneg %p1933_p4 }
  0x95   : > { %p1940_p3 = por %p1939_p2, %p1938_p7 }
  0x97   : > { %p1941_p5 = pnand %p1940_p3, %p1934_p11 }
  0x99   : > { %1944 = shalt.err (!%p1941_p5)
}
  0x9a   : > { %s1945_s29 = scalar_lea.vmem %s2348_s28, 128  ;;  %s2076_s9 = smov [#allocation2]  }
  0x9b   : > { %p1946_p12 = scmp.ne.s32.totalorder %s2348_s28, %s1945_s29  ;;  %s1950_s14 = sshll.u32 %s2076_s9, 4  ;;  %s1951_s14 = int_to_ptr.vmem [resolvable:$false] %s1950_s14 }
  0x9c   : > { %s1952_s12 = scalar_lea.vmem %s1951_s14, 256  ;;  %p1953_p10 = scmp.lt.s32.totalorder %s2348_s28, %s1951_s14 }
  0x9d   : > { %p1948_p1 = pnand %p1946_p12, %p2680_p8  ;;  %p1954_p0 = scmp.lt.s32.totalorder %s1952_s12, %s1945_s29 }
  0x9f   : > { %p1949_p6 = pneg %p1948_p1  ;;  %p1955_p4 = por %p1954_p0, %p1953_p10 }
  0xa1   : > { %p1956_p9 = pnand %p1955_p4, %p1949_p6 }
  0xa3   : > { %1959 = shalt.err (!%p1956_p9)
}
  0xa4   : > { %p2681_p11 = scmp.ne.s32.totalorder %s2672_s27, 0  ;;  %s414_s24 = scalar_lea.vmem [#allocation7], %s2256_s11 }
  0xa5   : > { %s421_s22 = sshll.u32 %s414_s24, 4  ;;  %s1960_s17 = scalar_lea.hbm %s2354_s30, 128  ;;  %s422_s22 = int_to_ptr.vmem [resolvable:$true] %s421_s22 }
  0xa6   : > { %1733 = dma.hbm_to_vmem [thread:$0]  (!%p2681_p11), %s2345_s3, 128, %s2348_s28, %s375_s1  }
  0xa7   : > { %p1961_p13 = scmp.ne.s32.totalorder %s2354_s30, %s1960_s17  ;;  %s1965_s10 = scalar_lea.hbm %s2618_s2, 256 }
  0xa8   : > { %p1966_p3 = scmp.lt.u32.totalorder %s2354_s30, %s2618_s2  ;;  %p1967_p5 = scmp.lt.u32.totalorder %s1965_s10, %s1960_s17 }
  0xa9   : > { %p1963_p7 = pnand %p1961_p13, %p2680_p8  ;;  %p1969_p1 = scmp.lt.u32.totalorder %s1960_s17, %s2354_s30 }
  0xaa   : > { %p1968_p12 = por %p1967_p5, %p1966_p3 }
  0xab   : > { %p1964_p2 = pneg %p1963_p7 }
  0xac   : > { %p1970_p6 = por %p1969_p1, %p1968_p12 }
  0xae   : > { %p1971_p10 = pnand %p1970_p6, %p1964_p2 }
  0xb0   : > { %1974 = shalt.err (!%p1971_p10)
}
  0xb1   : > { %s1975_s11 = scalar_lea.vmem %s422_s22, 128  ;;  %s2077_s3 = smov [#allocation7]  }
  0xb2   : > { %p1976_p0 = scmp.ne.s32.totalorder %s422_s22, %s1975_s11  ;;  %s1980_s28 = sshll.u32 %s2077_s3, 4  ;;  %s1981_s28 = int_to_ptr.vmem [resolvable:$false] %s1980_s28 }
  0xb3   : > { %s1982_s1 = scalar_lea.vmem %s1981_s28, 256  ;;  %p1983_p13 = scmp.lt.s32.totalorder %s422_s22, %s1981_s28 }
  0xb4   : > { %p1978_p4 = pnand %p1976_p0, %p2680_p8  ;;  %p1984_p7 = scmp.lt.s32.totalorder %s1982_s1, %s1975_s11 }
  0xb6   : > { %p1979_p9 = pneg %p1978_p4  ;;  %p1985_p11 = por %p1984_p7, %p1983_p13 }
  0xb8   : > { %p1986_p3 = pnand %p1985_p11, %p1979_p9 }
  0xba   : > { %1989 = shalt.err (!%p1986_p3)
}
  0xbb   : > { %p2682_p5 = scmp.ne.s32.totalorder %s2672_s27, 0  ;;  %p2683_p2 = scmp.ne.s32.totalorder %s2663_s25, 0 }
  0xbc   : > { %s2401_s16 = sand.u32 (!%p2683_p2), 1, %s2060_s18   ;;  %p2684_p8 = scmp.ne.s32.totalorder (!%p2683_p2), %s2660_s23, 0 }
  0xbd   : > { %1739 = dma.hbm_to_vmem [thread:$0]  (!%p2682_p5), %s2354_s30, 128, %s422_s22, %s2272_s13  }
  0xbe   : > { %430 = sbr.rel (%p2683_p2) target bundleno = 2350 (0x92e), region = 64  ;;  %s2404_s29 = sshll.u32 (!%p2683_p2), %s2401_s16, 3 }
  0xbf   : > { %s433_s9 = scalar_lea.sflag (!%p2683_p2), [#allocation3], %s2401_s16  ;;  %s436_s14 = scalar_lea.vmem (!%p2683_p2), [#allocation2], %s2404_s29 }
  0xc5   : > { %2035 = dma.done.wait (%p2684_p8), %s433_s9, 128  }
  0xc6   : > { %2037 = vsyncadd (%p2684_p8), %s433_s9, 4294967168  ;;  %s441_s25 = sand.u32 1, %s2165_s21   ;;  %s445_s27 = scalar_lea.vmem [#allocation5], %s2404_s29 }
  0xc7   : > { %s442_s13 = scalar_lea.sflag [#allocation6], %s441_s25 }
  0xc8   : > { %2039 = dma.done.wait (%p2684_p8), %s442_s13, 256  }
  0xc9   : > { %2041 = vsyncadd (%p2684_p8), %s442_s13, 4294967040  ;;  %s454_s30 = scalar_lea.vmem [#allocation7], %s2404_s29  ;;  %p2685_p11 = scmp.eq.s32.totalorder %s2165_s21, 0 }
  0xcb   : > { %2043 = dma.done.wait (%p2685_p11), [#allocation9], 512   ;;  %p2686_p12 = pmov %p2685_p11 }
  0xcc   : > { %p2687_p1 = pmov %p2685_p11 }
  0xcd   : > { %2045 = vsyncadd (%p2686_p12), [#allocation9], 4294966784 }
  0xce   : > { %2047 = dma.done.wait (%p2687_p1), [#allocation12], 16   ;;  %p2688_p6 = pmov %p2687_p1 }
  0xcf   : > { %v2078_v0 = vmov 0.0   ;;  %vm2079_vm0 = vmmov 0   ;;  %v1794_v1 = vld [vmem:[#allocation8] sm:$0xff]   ;;  %v1795_v2 = vld [vmem:[%s2621_s5] sm:$0xff]   ;;  %v1796_v3 = vld [vmem:[#allocation8 + $0x8] sm:$0xff]   ;;  %vm545_vm1 = vcmask 261120  }
  0xd0   : > { %2049 = vsyncadd (%p2688_p6), [#allocation12], 4294967280  ;;  %1604 = vmatprep.subr.bf16.mxu0 %v2078_v0  ;;  %1612 = vmatprep.subr.bf16.mxu1 %v2078_v0  ;;  %v1797_v4 = vld [vmem:[%s2621_s5 + $0x8] sm:$0xff]   ;;  %v518_v6 = vld [vmem:[%s445_s27] sm:$0xff]  ;;  %s2689_s15 = sld [smem:[#allocation27_spill]]  ;;  %vm724_vm2 = vcmask 64512  }
  0xd1   : > { %1608 = vmatprep.mubr.msk.bf16.mxu0 %vm2079_vm0, %v2078_v0  ;;  %1616 = vmatprep.mubr.msk.bf16.mxu1 %vm2079_vm0, %v2078_v0  ;;  %v516_v5 = vld [vmem:[%s436_s14] sm:$0xff]  ;;  %v519_v8 = vpack.c.bf16 %v518_v6, %v518_v6  ;;  %s2080_s26 = smov 120   ;;  %v1550_v28 = vld [vmem:[#allocation11] ss:$0 sm:$0xff]  ;;  %s2081_s11 = smov 112   ;;  %vm784_vm3 = vcmask 1043456  }
  0xd2   : > { %1605 = vmatpush3.bf16.msra.mxu0 %v1794_v1  ;;  %1613 = vmatpush3.bf16.msra.mxu1 %v1795_v2  ;;  %v517_v7 = vpack.c.bf16 %v516_v5, %v516_v5  ;;  %v1798_v9 = vld [vmem:[#allocation10] sm:$0xff]   ;;  %v1799_v10 = vld [vmem:[#allocation10 + $0x8] sm:$0xff]   ;;  %s2082_s3 = smov 104   ;;  %s2690_s9 = sld [smem:[#allocation28_spill]] }
  0xd3   : > { %1606 = vmatprep.subr.bf16.mxu0 %v2078_v0  ;;  %1614 = vmatprep.subr.bf16.mxu1 %v2078_v0  ;;  %v520_v11 = vld [vmem:[%s454_s30] sm:$0xff]  ;;  %s2691_s22 = sld [smem:[#allocation29_spill]]  ;;  %s2692_s17 = sld [smem:[#allocation24_spill]] }
  0xd4   : > { %v521_v12 = vpack.c.bf16 %v520_v11, %v520_v11  ;;  %v1546_v13 = vld [vmem:[%s2622_s6] ss:$0 sm:$0xff]  ;;  %s1568_s4 = sshll.u32 %s2165_s21, 7  ;;  %s514_s20 = scalar_lea.vmem [#allocation13], %s2404_s29 }
  0xd5   : > { %s1380_s10 = sshll.u32 %s514_s20, 4  ;;  %s1367_s21 = scalar_lea.sflag [#allocation4], %s2401_s16  ;;  %s2573_s10 = int_to_ptr.vmem [resolvable:$true] %s1380_s10 }
  0xd6   : > { %1607 = vmatpush3.bf16.msra.mxu0 %v1796_v3  ;;  %1615 = vmatpush3.bf16.msra.mxu1 %v1797_v4  ;;  %v1542_v14 = vld [vmem:[%s2689_s15] ss:$0 sm:$0xff]  ;;  %s1990_s29 = scalar_lea.vmem %s2573_s10, 128  ;;  %s2083_s28 = smov [#allocation13]  }
  0xd7   : > { %1620 = vmatprep.subr.bf16.mxu0 %v2078_v0  ;;  %1628 = vmatprep.subr.bf16.mxu1 %v2078_v0  ;;  %p1991_p10 = scmp.ne.s32.totalorder %s2573_s10, %s1990_s29  ;;  %s1994_s1 = sshll.u32 %s2083_s28, 4  ;;  %s1995_s1 = int_to_ptr.vmem [resolvable:$false] %s1994_s1 }
  0xd8   : > { %v831_v60 = vld [vmem:[%s2690_s9] sm:$0xf]  ;;  %v946_v2 = vld [vmem:[%s2690_s9 + $0x4] sm:$0xf]  ;;  %s1996_s14 = scalar_lea.vmem %s1995_s1, 256  ;;  %p1997_p13 = scmp.lt.s32.totalorder %s2573_s10, %s1995_s1 }
  0xd9   : > { %1609 = vmatmul.mubr.msk.bf16.vlgmr.msra.gmra.mrb[0].mxu0 %vm545_vm1, %v517_v7  ;;  %1617 = vmatmul.mubr.msk.bf16.vlgmr.msra.gmra.mrb[0].mxu1 %vm545_vm1, %v519_v8  ;;  %v997_v1 = vsel %vm784_vm3, %v831_v60, 0  ;;  %v951_v3 = vsel %vm784_vm3, %v946_v2, 0  ;;  %p2694_p0 = scmp.ne.s32.totalorder %s2692_s17, 0  ;;  %p1998_p7 = scmp.lt.s32.totalorder %s1996_s14, %s1990_s29 }
  0xda   : > { %1621 = vmatpush3.bf16.msra.mxu0 %v1798_v9  ;;  %1624 = vmatprep.mubr.msk.bf16.mxu0 %vm2079_vm0, %v2078_v0 }
  0xdb   : > { %1622 = vmatprep.subr.bf16.mxu0 %v2078_v0  ;;  %1630 = vmatprep.mubr.msk.bf16.mxu1 %vm2079_vm0, %v2078_v0  ;;  %p1992_p4 = pnand %p1991_p10, %p2694_p0  ;;  %p1999_p3 = por %p1998_p7, %p1997_p13 }
  0xdd   : > { %p1993_p9 = pneg %p1992_p4 }
  0xde   : > { %1623 = vmatpush3.bf16.msra.mxu0 %v1799_v10 }
  0xdf   : > { %1634 = vmatprep.subr.bf16.mxu0 %v2078_v0  ;;  %p2000_p5 = pnand %p1999_p3, %p1993_p9 }
  0xe1   : > { %1625 = vmatmul.mubr.msk.bf16.vlgmr.msra.gmra.mrb[4].mxu0 %vm545_vm1, %v521_v12 }
  0xe2   : > { %1636 = vmatprep.mubr.msk.bf16.mxu0 %vm2079_vm0, %v2078_v0 }
 0x1ac   : > { %v583_v15 = vpop.f32.mrb[0].mxu0  ;;  %v650_v16 = vpop.f32.mrb[0].mxu1 }
 0x1ad   : > { %v1610_v17 = vpop.f32.mrb[1].mxu0  ;;  %v651_v18 = vadd.f32 %v1546_v13, %v650_v16  ;;  %v1618_v19 = vpop.f32.mrb[1].mxu1  ;;  %v584_v20 = vadd.f32 %v1542_v14, %v583_v15 }
 0x1ae   : > { %v586_v21 = vpop.f32.mrb[2].mxu0  ;;  %v653_v22 = vpop.f32.mrb[2].mxu1 }
 0x1af   : > { %v1611_v23 = vpop.f32.mrb[3].mxu0  ;;  %v2462_v24 = vpack.c.bf16 %v651_v18, %v651_v18  ;;  %v1619_v25 = vpop.f32.mrb[3].mxu1  ;;  %v2464_v26 = vpack.c.bf16 %v584_v20, %v584_v20 }
 0x1b1   : > { %836 = vrot.lane.b32.xlu0 %v2462_v24, %s2080_s26  ;;  %v729_v27 = vsel %vm724_vm2, %v2462_v24, 0 }
 0x1b2   : > { %1629 = vmatpush3.bf16.xpose.msra.mxu1 %v729_v27 }
 0x1b3   : > { %1640 = vmatprep.subr.bf16.mxu1 %v2078_v0 }
 0x1b4   : > { %v717_v29 = vpop.f32.mrb[4].mxu0 }
 0x1b5   : > { %v718_v30 = vadd.f32 %v1550_v28, %v717_v29  ;;  %v1626_v31 = vpop.f32.mrb[5].mxu0  ;;  %833 = vrot.lane.b32.xlu0 %v2464_v26, %s2080_s26 }
 0x1b6   : > { %v720_v32 = vpop.f32.mrb[6].mxu0 }
 0x1b7   : > { %v2471_v33 = vpack.c.bf16 %v718_v30, %v718_v30  ;;  %v1627_v34 = vpop.f32.mrb[7].mxu0 }
 0x1b9   : > { %1631 = vmatmul.mubr.msk.bf16.vlgmr.msra.gmra.mrb[4].mxu1 %vm724_vm2, %v2464_v26  ;;  %895 = vrot.lane.b32.xlu0 %v2471_v33, %s2080_s26  ;;  %v786_v43 = vsel %vm784_vm3, %v2471_v33, 0 }
 0x1ba   : > { %1642 = vmatprep.mubr.msk.bf16.mxu1 %vm2079_vm0, %v2078_v0  ;;  %1635 = vmatpush3.bf16.msra.mxu0 %v786_v43 }
 0x1bb   : > { %1646 = vmatprep.subr.bf16.mxu0 %v2078_v0 }
 0x1bd   : > { %1041 = vrot.lane.b32.xlu0 %v2462_v24, %s2081_s11 }
 0x223   : > { %v837_v35 = vpop.permute.xlu0 %836 }
 0x224   : > { %v842_v36 = vsel %vm724_vm2, %v837_v35, 0 }
 0x225   : > { %1641 = vmatpush3.bf16.xpose.msra.mxu1 %v842_v36 }
 0x226   : > { %1652 = vmatprep.subr.bf16.mxu1 %v2078_v0 }
 0x227   : > { %v834_v37 = vpop.permute.xlu0 %833 }
 0x22b   : > { %v896_v53 = vpop.permute.xlu0 %895 }
 0x22c   : > { %1643 = vmatmul.mubr.msk.bf16.vlgmr.msra.gmra.mrb[8].mxu1 %vm724_vm2, %v834_v37  ;;  %v901_v54 = vsel %vm784_vm3, %v896_v53, 0 }
 0x22d   : > { %1654 = vmatprep.mubr.msk.bf16.mxu1 %vm2079_vm0, %v2078_v0  ;;  %1653 = vmatpush3.bf16.msra.mxu1 %v951_v3 }
 0x22e   : > { %1664 = vmatprep.subr.bf16.mxu1 %v2078_v0 }
 0x22f   : > { %v1042_v4 = vpop.permute.xlu0 %1041 }
 0x230   : > { %v1047_v23 = vsel %vm724_vm2, %v1042_v4, 0 }
 0x28c   : > { %v765_v38 = vpop.f32.mrb[4].mxu1 }
 0x28d   : > { %v1632_v39 = vpop.f32.mrb[5].mxu1  ;;  %v771_v40 = vsel %vm724_vm2, %v765_v38, -inf }
 0x28e   : > { %772 = vmax.xlane.f32.xlu1 %v771_v40  ;;  %v768_v41 = vpop.f32.mrb[6].mxu1 }
 0x28f   : > { %v1633_v42 = vpop.f32.mrb[7].mxu1 }
 0x2ff   : > { %v878_v44 = vpop.f32.mrb[8].mxu1 }
 0x300   : > { %v1644_v45 = vpop.f32.mrb[9].mxu1  ;;  %v884_v46 = vsel %vm724_vm2, %v878_v44, -inf }
 0x301   : > { %885 = vmax.xlane.f32.xlu1 %v884_v46  ;;  %v881_v47 = vpop.f32.mrb[10].mxu1 }
 0x302   : > { %v1645_v48 = vpop.f32.mrb[11].mxu1 }
 0x31b   : > { %v773_v49 = vpop.xlane.xlu1 %772 }
 0x31c   : > { %v774_v50 = vsub.f32 %v765_v38, %v773_v49  ;;  %v1150_v49 = vld [vmem:[%s2690_s9 + $0x8] sm:$0xf] }
 0x31e   : > { %v775_v51 = vmul.f32 1.442695, %v774_v50  ;;  %v1155_v50 = vsel %vm784_vm3, %v1150_v49, 0 }
 0x320   : > { %1800 = vpow2.f32 %v775_v51 }
 0x32a   : > { %v1801_v52 = vpop.eup %1800 }
 0x32b   : > { %v777_v55 = vsel %vm724_vm2, %v1801_v52, 0.0  ;;  %v780_v56 = vpack.c.bf16 %v1801_v52, %v1801_v52 }
 0x32c   : > { %778 = vadd.xlane.f32.xlu0 %v777_v55 }
 0x32d   : > { %1637 = vmatmul.mubr.msk.bf16.vlgmr.msra.gmra.mrb[8].mxu0 %vm724_vm2, %v780_v56 }
 0x32e   : > { %1647 = vmatpush3.bf16.msra.mxu0 %v901_v54  ;;  %1648 = vmatprep.mubr.msk.bf16.mxu0 %vm2079_vm0, %v2078_v0 }
 0x32f   : > { %1658 = vmatprep.subr.bf16.mxu0 %v2078_v0 }
 0x342   : > { %1099 = vrot.lane.b32.xlu0 %v2471_v33, %s2081_s11 }
 0x346   : > { %1198 = vrot.lane.b32.xlu0 %v2464_v26, %s2082_s3 }
 0x38e   : > { %v886_v57 = vpop.xlane.xlu1 %885 }
 0x38f   : > { %v887_v58 = vsub.f32 %v878_v44, %v886_v57 }
 0x391   : > { %v888_v59 = vmul.f32 1.442695, %v887_v58 }
 0x393   : > { %1802 = vpow2.f32 %v888_v59 }
 0x39d   : > { %v1803_v61 = vpop.eup %1802 }
 0x39e   : > { %v890_v62 = vsel %vm724_vm2, %v1803_v61, 0.0  ;;  %v893_v63 = vpack.c.bf16 %v1803_v61, %v1803_v61 }
 0x39f   : > { %891 = vadd.xlane.f32.xlu1 %v890_v62 }
 0x3a0   : > { %1649 = vmatmul.mubr.msk.bf16.vlgmr.msra.gmra.mrb[12].mxu0 %vm724_vm2, %v893_v63 }
 0x3a1   : > { %1659 = vmatpush3.bf16.msra.mxu0 %v997_v1  ;;  %1660 = vmatprep.mubr.msk.bf16.mxu0 %vm2079_vm0, %v2078_v0 }
 0x3a2   : > { %1670 = vmatprep.subr.bf16.mxu0 %v2078_v0 }
 0x3b0   : > { %1039 = vrot.lane.b32.xlu1 %v2464_v26, %s2081_s11  ;;  %s2693_s11 = sld [smem:[#allocation30_spill]] }
 0x3b9   : > { %v779_v5 = vpop.xlane.xlu0 %778 }
 0x3ba   : > { %1804 = vrcp.f32 %v779_v5 }
 0x3bd   : > { %v1100_v10 = vpop.permute.xlu0 %1099 }
 0x3be   : > { %v1105_v14 = vsel %vm784_vm3, %v1100_v10, 0 }
 0x3c4   : > { %v1805_v6 = vpop.eup %1804 }
 0x400   : > { %v822_v7 = vpop.f32.mrb[8].mxu0 }
 0x401   : > { %v829_v8 = vmul.f32 %v1805_v6, %v822_v7  ;;  %v1638_v9 = vpop.f32.mrb[9].mxu0 }
 0x402   : > { %v825_v11 = vpop.f32.mrb[10].mxu0 }
 0x403   : > { %v830_v12 = vpack.c.bf16 %v829_v8, %v829_v8  ;;  %v1639_v13 = vpop.f32.mrb[11].mxu0 }
 0x405   : > { %1661 = vmatmul.mubr.msk.bf16.vlgmr.msra.gmra.mrb[16].mxu0 %vm724_vm2, %v830_v12 }
 0x406   : > { %1671 = vmatpush3.bf16.msra.mxu0 %v1105_v14  ;;  %1672 = vmatprep.mubr.msk.bf16.mxu0 %vm2079_vm0, %v2078_v0 }
 0x407   : > { %1682 = vmatprep.subr.bf16.mxu0 %v2078_v0 }
 0x42c   : > { %v892_v15 = vpop.xlane.xlu1 %891 }
 0x42d   : > { %1806 = vrcp.f32 %v892_v15 }
 0x430   : > { %v1040_v25 = vpop.permute.xlu1 %1039 }
 0x437   : > { %v1807_v16 = vpop.eup %1806 }
 0x473   : > { %v937_v17 = vpop.f32.mrb[12].mxu0 }
 0x474   : > { %v944_v18 = vmul.f32 %v1807_v16, %v937_v17  ;;  %v1650_v19 = vpop.f32.mrb[13].mxu0 }
 0x475   : > { %v940_v20 = vpop.f32.mrb[14].mxu0 }
 0x476   : > { %v945_v21 = vpack.c.bf16 %v944_v18, %v944_v18  ;;  %v1651_v22 = vpop.f32.mrb[15].mxu0 }
 0x478   : > { %1655 = vmatmul.mubr.msk.bf16.vlgmr.msra.gmra.mrb[12].mxu1 %vm724_vm2, %v945_v21 }
 0x479   : > { %1665 = vmatpush3.bf16.xpose.msra.mxu1 %v1047_v23  ;;  %1666 = vmatprep.mubr.msk.bf16.mxu1 %vm2079_vm0, %v2078_v0  ;;  %v1566_v23 = vld [vmem:[%s2691_s22] ss:$0 sm:$0xff] }
 0x47a   : > { %1676 = vmatprep.subr.bf16.mxu1 %v2078_v0 }
 0x480   : > { %1667 = vmatmul.mubr.msk.bf16.vlgmr.msra.gmra.mrb[16].mxu1 %vm724_vm2, %v1040_v25 }
 0x481   : > { %1678 = vmatprep.mubr.msk.bf16.mxu1 %vm2079_vm0, %v2078_v0  ;;  %1677 = vmatpush3.bf16.msra.mxu1 %v1155_v50 }
 0x482   : > { %1688 = vmatprep.subr.bf16.mxu1 %v2078_v0 }
 0x4d8   : > { %v1033_v26 = vpop.f32.mrb[16].mxu0 }
 0x4d9   : > { %v1662_v27 = vpop.f32.mrb[17].mxu0 }
 0x4da   : > { %v1036_v28 = vpop.f32.mrb[18].mxu0 }
 0x4db   : > { %v1663_v29 = vpop.f32.mrb[19].mxu0 }
 0x54b   : > { %v987_v30 = vpop.f32.mrb[12].mxu1 }
 0x54c   : > { %v2529_v31 = vadd.f32 %v1033_v26, %v987_v30  ;;  %v1656_v32 = vpop.f32.mrb[13].mxu1 }
 0x54d   : > { %v990_v34 = vpop.f32.mrb[14].mxu1 }
 0x54e   : > { %v1657_v35 = vpop.f32.mrb[15].mxu1 }
 0x553   : > { %v1083_v36 = vpop.f32.mrb[16].mxu1 }
 0x554   : > { %v1668_v37 = vpop.f32.mrb[17].mxu1  ;;  %v1089_v38 = vsel %vm724_vm2, %v1083_v36, -inf }
 0x555   : > { %1090 = vmax.xlane.f32.xlu1 %v1089_v38  ;;  %v1086_v39 = vpop.f32.mrb[18].mxu1 }
 0x556   : > { %v1669_v40 = vpop.f32.mrb[19].mxu1 }
 0x566   : > { %1200 = vrot.lane.b32.xlu1 %v2462_v24, %s2082_s3  ;;  %v1199_v24 = vpop.permute.xlu0 %1198 }
 0x5e2   : > { %v1091_v41 = vpop.xlane.xlu1 %1090 }
 0x5e3   : > { %v1092_v42 = vsub.f32 %v1083_v36, %v1091_v41 }
 0x5e5   : > { %v1093_v43 = vmul.f32 1.442695, %v1092_v42 }
 0x5e6   : > { %v1201_v45 = vpop.permute.xlu1 %1200 }
 0x5e7   : > { %1808 = vpow2.f32 %v1093_v43  ;;  %v1206_v48 = vsel %vm724_vm2, %v1201_v45, 0 }
 0x5f1   : > { %v1809_v44 = vpop.eup %1808 }
 0x5f2   : > { %v1095_v46 = vsel %vm724_vm2, %v1809_v44, 0.0  ;;  %v1098_v47 = vpack.c.bf16 %v1809_v44, %v1809_v44 }
 0x5f3   : > { %1096 = vadd.xlane.f32.xlu0 %v1095_v46 }
 0x5f4   : > { %1673 = vmatmul.mubr.msk.bf16.vlgmr.msra.gmra.mrb[20].mxu0 %vm724_vm2, %v1098_v47 }
 0x5f5   : > { %1683 = vmatpush3.bf16.xpose.msra.mxu0 %v1206_v48  ;;  %1684 = vmatprep.mubr.msk.bf16.mxu0 %vm2079_vm0, %v2078_v0 }
 0x5f6   : > { %1694 = vmatprep.subr.bf16.mxu0 %v2078_v0 }
 0x5fc   : > { %1685 = vmatmul.mubr.msk.bf16.vlgmr.msra.gmra.mrb[24].mxu0 %vm724_vm2, %v1199_v24 }
 0x5fd   : > { %1696 = vmatprep.mubr.msk.bf16.mxu0 %vm2079_vm0, %v2078_v0 }
 0x609   : > { %1258 = vrot.lane.b32.xlu0 %v2471_v33, %s2082_s3  ;;  %s2571_s3 = scalar_lea.hbm %s2693_s11, %s1568_s4 }
 0x680   : > { %v1097_v51 = vpop.xlane.xlu0 %1096 }
 0x681   : > { %1810 = vrcp.f32 %v1097_v51 }
 0x684   : > { %v1259_v56 = vpop.permute.xlu0 %1258 }
 0x685   : > { %v1264_v33 = vsel %vm784_vm3, %v1259_v56, 0 }
 0x68b   : > { %v1811_v52 = vpop.eup %1810 }
 0x6c7   : > { %v1141_v53 = vpop.f32.mrb[20].mxu0 }
 0x6c8   : > { %v1148_v54 = vmul.f32 %v1811_v52, %v1141_v53  ;;  %v1674_v55 = vpop.f32.mrb[21].mxu0 }
 0x6c9   : > { %v1144_v57 = vpop.f32.mrb[22].mxu0 }
 0x6ca   : > { %v1149_v58 = vpack.c.bf16 %v1148_v54, %v1148_v54  ;;  %v1675_v59 = vpop.f32.mrb[23].mxu0 }
 0x6cc   : > { %1679 = vmatmul.mubr.msk.bf16.vlgmr.msra.gmra.mrb[20].mxu1 %vm724_vm2, %v1149_v58 }
 0x6cd   : > { %1689 = vmatpush3.bf16.msra.mxu1 %v1264_v33  ;;  %1690 = vmatprep.mubr.msk.bf16.mxu1 %vm2079_vm0, %v2078_v0  ;;  %v1309_v0 = vld [vmem:[%s2690_s9 + $0xc] sm:$0xf] }
 0x6ce   : > { %v1314_v8 = vsel %vm784_vm3, %v1309_v0, 0 }
 0x6cf   : > { %v1242_v60 = vpop.f32.mrb[24].mxu0  ;;  %1695 = vmatpush3.bf16.msra.mxu0 %v1314_v8 }
 0x6d0   : > { %v1686_v61 = vpop.f32.mrb[25].mxu0  ;;  %v1248_v62 = vsel %vm724_vm2, %v1242_v60, -inf }
 0x6d1   : > { %1249 = vmax.xlane.f32.xlu1 %v1248_v62  ;;  %v1245_v63 = vpop.f32.mrb[26].mxu0 }
 0x6d2   : > { %v1687_v1 = vpop.f32.mrb[27].mxu0 }
 0x75e   : > { %v1250_v2 = vpop.xlane.xlu1 %1249 }
 0x75f   : > { %v1251_v3 = vsub.f32 %v1242_v60, %v1250_v2 }
 0x761   : > { %v1252_v4 = vmul.f32 1.442695, %v1251_v3 }
 0x763   : > { %1812 = vpow2.f32 %v1252_v4 }
 0x76d   : > { %v1813_v5 = vpop.eup %1812 }
 0x76e   : > { %v1254_v6 = vsel %vm724_vm2, %v1813_v5, 0.0  ;;  %v1257_v7 = vpack.c.bf16 %v1813_v5, %v1813_v5 }
 0x76f   : > { %1255 = vadd.xlane.f32.xlu1 %v1254_v6 }
 0x770   : > { %1691 = vmatmul.mubr.msk.bf16.vlgmr.msra.gmra.mrb[24].mxu1 %vm724_vm2, %v1257_v7 }
 0x79f   : > { %v1191_v9 = vpop.f32.mrb[20].mxu1 }
 0x7a0   : > { %v1197_v10 = vadd.f32 %v1191_v9, %v2529_v31  ;;  %v1680_v11 = vpop.f32.mrb[21].mxu1 }
 0x7a1   : > { %v1194_v12 = vpop.f32.mrb[22].mxu1 }
 0x7a2   : > { %v1681_v13 = vpop.f32.mrb[23].mxu1 }
 0x7fc   : > { %v1256_v14 = vpop.xlane.xlu1 %1255 }
 0x7fd   : > { %1814 = vrcp.f32 %v1256_v14 }
 0x807   : > { %v1815_v15 = vpop.eup %1814 }
 0x843   : > { %v1300_v16 = vpop.f32.mrb[24].mxu1 }
 0x844   : > { %v1307_v17 = vmul.f32 %v1815_v15, %v1300_v16  ;;  %v1692_v18 = vpop.f32.mrb[25].mxu1 }
 0x845   : > { %v1303_v19 = vpop.f32.mrb[26].mxu1 }
 0x846   : > { %v1308_v20 = vpack.c.bf16 %v1307_v17, %v1307_v17  ;;  %v1693_v21 = vpop.f32.mrb[27].mxu1 }
 0x848   : > { %1697 = vmatmul.mubr.msk.bf16.vlgmr.msra.gmra.mrb[28].mxu0 %vm724_vm2, %v1308_v20 }
 0x91b   : > { %v1350_v22 = vpop.f32.mrb[28].mxu0 }
 0x91c   : > { %v1356_v25 = vadd.f32 %v1350_v22, %v1197_v10  ;;  %v1698_v26 = vpop.f32.mrb[29].mxu0 }
 0x91d   : > { %v1353_v27 = vpop.f32.mrb[30].mxu0 }
 0x91e   : > { %v1364_v28 = vadd.f32 %v1566_v23, %v1356_v25  ;;  %v1699_v29 = vpop.f32.mrb[31].mxu0 }
 0x920   : > { %1365 = vst.msk [vmem:[%s514_s20] sm:$0xff] %vm545_vm1, %v1364_v28 }
 0x921   : > { %2003 = shalt.err (!%p2000_p5)
}
 0x922   : > { %s2004_s16 = scalar_lea.hbm %s2571_s3, 128  ;;  %s2008_s27 = scalar_lea.hbm %s2693_s11, 256 }
 0x923   : > { %p2005_p2 = scmp.ne.s32.totalorder %s2571_s3, %s2004_s16  ;;  %p2009_p12 = scmp.lt.u32.totalorder %s2571_s3, %s2693_s11 }
 0x924   : > { %p2010_p1 = scmp.lt.u32.totalorder %s2008_s27, %s2004_s16  ;;  %p2012_p10 = scmp.lt.u32.totalorder %s2004_s16, %s2571_s3 }
 0x925   : > { %p2006_p8 = pnand %p2005_p2, %p2694_p0 }
 0x926   : > { %p2011_p6 = por %p2010_p1, %p2009_p12 }
 0x927   : > { %p2007_p11 = pneg %p2006_p8 }
 0x928   : > { %p2013_p4 = por %p2012_p10, %p2011_p6 }
 0x92a   : > { %p2014_p9 = pnand %p2013_p4, %p2007_p11 }
 0x92c   : > { %2017 = shalt.err (!%p2014_p9)
}
 0x92d   : > { %1718 = dma.vmem_to_hbm [thread:$0]  (%p2694_p0), %s2573_s10, 128, %s2571_s3, %s1367_s21  }
 0x92e PF: > { %s2695_s12 = sld [smem:[#allocation19_spill]]  ;;  %s2696_s24 = sld [smem:[#allocation21_spill]] }
 0x92f   : > { %s2697_s22 = sld [smem:[#allocation20_spill]] }
 0x934   : > { %s1392_s4 = sand.u32 1, %s2695_s12   ;;  %p2698_p13 = scmp.ne.s32.totalorder %s2696_s24, 0 }
 0x935   : > { %p2699_p7 = scmp.ge.s32.totalorder %s2697_s22, 2  ;;  %s1393_s20 = scalar_lea.sflag [#allocation4], %s1392_s4 }
 0x937   : > { %p1741_p3 = pnand %p2699_p7, %p2698_p13 }
 0x939   : > { %2051 = dma.done.wait (!%p1741_p3), %s1393_s20, 128  }
 0x93a   : > { %2053 = vsyncadd (!%p1741_p3), %s1393_s20, 4294967168  ;;  %s2700_s20 = sld [smem:[#allocation22_spill]]  ;;  %s2701_s15 = sld [smem:[#allocation23_spill]] }
 0x93b   : > { %s2702_s17 = smov %s2060_s18  ;;  %s2703_s18 = smov %s2064_s19 }
 0x940   : > { %p29_p5 = scmp.ge.s32.totalorder %s2700_s20, 4   ;;  %s2704_s19 = smov %s2701_s15 }
 0x942   :  { %31 = sbr.rel (!%p29_p5) target bundleno = 16 (0x10), region = 145 }
 0x949   :  { %1398 = vsyncpa [#allocation3], 1 }
 0x94a   :  { %1400 = vsyncpa [#allocation3 + $0x1], 1 }
 0x94b   :  { %1401 = vsyncpa [#allocation6], 1 }
 0x94c   :  { %1403 = vsyncpa [#allocation6 + $0x1], 1 }
 0x94d   :  { %1404 = vsyncpa [#allocation9], 1 }
 0x94e   :  { %1405 = vsyncpa [#allocation12], 1 }
 0x94f   :  { %1406 = vsyncpa [#allocation4], 1 }
 0x950   :  { %1408 = vsyncpa [#allocation4 + $0x1], 1 }

</bundles_post_ra>
